<compile_context>
chip_gen: v7x
topology: tpu7x:2x2x1
jax: 0.10.0
libtpu: 0.0.40
codegen_flags: <defaults>
</compile_context>

<pallas_src>
import jax
import jax.numpy as jnp
from jax import lax
from jax.experimental import pallas as pl
from jax.experimental.pallas import tpu as pltpu


def _smooth_loss_kernel(flow_ref, img_ref, out_ref):
    """One batch element per grid step.

    flow_ref: (1, 2, H, W)   img_ref: (1, C, H, W)
    out_ref : (1, 2, W)  -- row 0: x-term lane partial sums,
                            row 1: y-term lane partial sums.
    """
    flow = flow_ref[0].astype(jnp.float32)    # (2, H, W)
    img = img_ref[0].astype(jnp.float32)      # (C, H, W)
    _, H, W = flow.shape

    row_idx = lax.broadcasted_iota(jnp.int32, (H, W), 0)
    col_idx = lax.broadcasted_iota(jnp.int32, (H, W), 1)

    # ---- x direction: gradient along H (sublane axis). roll(H-1) == shift -1,
    # so rolled[h] = x[h+1]; row H-1 wraps and is masked out below. ----
    igx = img - pltpu.roll(img, H - 1, 1)              # (C, H, W)
    wx = jnp.exp(-jnp.mean(jnp.abs(igx), axis=0))      # (H, W)
    fgx = jnp.abs(flow - pltpu.roll(flow, H - 1, 1))   # (2, H, W)
    x_term = jnp.where(row_idx < H - 1, (fgx[0] + fgx[1]) * wx, 0.0)
    out_ref[0, 0:1, :] = jnp.sum(x_term, axis=0, keepdims=True)   # (1, W)

    # ---- y direction: gradient along W (lane axis); col W-1 wraps -> masked. ----
    igy = img - pltpu.roll(img, W - 1, 2)
    wy = jnp.exp(-jnp.mean(jnp.abs(igy), axis=0))
    fgy = jnp.abs(flow - pltpu.roll(flow, W - 1, 2))
    y_term = jnp.where(col_idx < W - 1, (fgy[0] + fgy[1]) * wy, 0.0)
    out_ref[0, 1:2, :] = jnp.sum(y_term, axis=0, keepdims=True)   # (1, W)


def smooth_loss(flow, image):
    """flow: (N, 2, H, W), image: (N, C, H, W) -> scalar float32 loss."""
    N, C, H, W = image.shape
    assert flow.shape == (N, 2, H, W)

    # TODO(synk): for very large H*W additionally tile over H with a 1-row halo
    # (keeping per-tile VMEM in the few-MiB range for v7x 64 MiB / v5e 16 MiB
    # scoped defaults); per-element shapes here fit comfortably.
    partials = pl.pallas_call(
        _smooth_loss_kernel,
        out_shape=jax.ShapeDtypeStruct((N, 2, W), jnp.float32),
        grid=(N,),
        in_specs=[
            pl.BlockSpec((1, 2, H, W), lambda n: (n, 0, 0, 0)),
            pl.BlockSpec((1, C, H, W), lambda n: (n, 0, 0, 0)),
        ],
        out_specs=pl.BlockSpec((1, 2, W), lambda n: (n, 0, 0)),
        compiler_params=pltpu.CompilerParams(
            dimension_semantics=("parallel",),
        ),
    )(flow, image)

    # Finish the means in the wrapper: one cross-lane/cross-batch reduce per
    # direction, with the two distinct denominators (never merged).
    sum_x = jnp.sum(partials[:, 0, :])
    sum_y = jnp.sum(partials[:, 1, :])
    loss_x = sum_x / jnp.float32(N * (H - 1) * W)   # both flow channels share this denom
    loss_y = sum_y / jnp.float32(N * H * (W - 1))
    return (loss_x + loss_y) * jnp.float32(0.5)


def smooth_loss_ref(flow, image):
    """Pure-JAX reference mirroring the PyTorch SmoothLoss module."""
    def grad_x(a):
        return a[:, :, :-1, :] - a[:, :, 1:, :]

    def grad_y(a):
        return a[:, :, :, :-1] - a[:, :, :, 1:]

    wx = jnp.exp(-jnp.mean(jnp.abs(grad_x(image)), axis=1, keepdims=True))
    wy = jnp.exp(-jnp.mean(jnp.abs(grad_y(image)), axis=1, keepdims=True))
    total = 0.0
    for i in range(2):
        f = flow[:, i:i + 1, :, :]
        total += jnp.mean(jnp.abs(grad_x(f) * wx)) + jnp.mean(jnp.abs(grad_y(f) * wy))
    return total / 2.0


if __name__ == "__main__":
    key = jax.random.PRNGKey(0)
    k1, k2 = jax.random.split(key)
    N, C, H, W = 2, 3, 16, 16
    flow = jax.random.normal(k1, (N, 2, H, W), dtype=jnp.float32)
    image = jax.random.normal(k2, (N, C, H, W), dtype=jnp.float32)

    loss = jax.block_until_ready(smooth_loss(flow, image))
    ref = jax.block_until_ready(smooth_loss_ref(flow, image))

    assert jnp.allclose(loss, ref, rtol=1e-5, atol=1e-5), (loss, ref)
    print("KERNEL_OK")
</pallas_src>

<mosaic_0001>
module attributes {stable_mosaic.version = 11 : i64} {
  func.func @_smooth_loss_kernel(%arg0: i32, %arg1: memref<1x2x16x16xf32, #tpu.memory_space<vmem>>, %arg2: memref<1x3x16x16xf32, #tpu.memory_space<vmem>>, %arg3: memref<1x2x16xf32, #tpu.memory_space<vmem>>) attributes {dimension_semantics = [#tpu.dimension_semantics<parallel>], iteration_bounds = array<i64: 2>, scalar_prefetch = 0 : i64, scratch_operands = 0 : i64, tpu.core_type = #tpu.core_type<tc>, window_params = [{transform_indices = @transform_0, window_bounds = array<i64: 1, 2, 16, 16>}, {transform_indices = @transform_1, window_bounds = array<i64: 1, 3, 16, 16>}, {transform_indices = @transform_2, window_bounds = array<i64: 1, 2, 16>}]} {
    %c0 = arith.constant 0 : index
    %c0_0 = arith.constant 0 : index
    %c0_1 = arith.constant 0 : index
    %c0_2 = arith.constant 0 : index
    %0 = vector.load %arg1[%c0, %c0_0, %c0_1, %c0_2] : memref<1x2x16x16xf32, #tpu.memory_space<vmem>>, vector<1x2x16x16xf32>
    %1 = vector.shape_cast %0 : vector<1x2x16x16xf32> to vector<2x16x16xf32>
    %c0_3 = arith.constant 0 : index
    %c0_4 = arith.constant 0 : index
    %c0_5 = arith.constant 0 : index
    %c0_6 = arith.constant 0 : index
    %2 = vector.load %arg2[%c0_3, %c0_4, %c0_5, %c0_6] : memref<1x3x16x16xf32, #tpu.memory_space<vmem>>, vector<1x3x16x16xf32>
    %3 = vector.shape_cast %2 : vector<1x3x16x16xf32> to vector<3x16x16xf32>
    %4 = tpu.iota {dimensions = array<i32: 0>} : vector<16x16xi32>
    %5 = tpu.iota {dimensions = array<i32: 1>} : vector<16x16xi32>
    %c15_i32 = arith.constant 15 : i32
    %6 = tpu.dynamic_rotate %3 by %c15_i32 dim 1 : vector<3x16x16xf32>, i32 -> vector<3x16x16xf32>
    %7 = arith.subf %3, %6 : vector<3x16x16xf32>
    %8 = math.absf %7 : vector<3x16x16xf32>
    %cst = arith.constant dense<0.000000e+00> : vector<16x16xf32>
    %9 = vector.multi_reduction <add>, %8, %cst [0] : vector<3x16x16xf32> to vector<16x16xf32>
    %cst_7 = arith.constant 3.000000e+00 : f32
    %10 = vector.broadcast %cst_7 : f32 to vector<16x16xf32>
    %11 = arith.divf %9, %10 : vector<16x16xf32>
    %cst_8 = arith.constant 0.000000e+00 : f32
    %12 = vector.broadcast %cst_8 : f32 to vector<16x16xf32>
    %13 = arith.subf %12, %11 : vector<16x16xf32>
    %14 = math.exp %13 : vector<16x16xf32>
    %c15_i32_9 = arith.constant 15 : i32
    %15 = tpu.dynamic_rotate %1 by %c15_i32_9 dim 1 : vector<2x16x16xf32>, i32 -> vector<2x16x16xf32>
    %16 = arith.subf %1, %15 : vector<2x16x16xf32>
    %17 = math.absf %16 : vector<2x16x16xf32>
    %c15_i32_10 = arith.constant 15 : i32
    %18 = vector.broadcast %c15_i32_10 : i32 to vector<16x16xi32>
    %19 = arith.cmpi slt, %4, %18 : vector<16x16xi32>
    %20 = vector.extract_strided_slice %17 {offsets = [0, 0, 0], sizes = [1, 16, 16], strides = [1, 1, 1]} : vector<2x16x16xf32> to vector<1x16x16xf32>
    %21 = vector.shape_cast %20 : vector<1x16x16xf32> to vector<16x16xf32>
    %22 = vector.extract_strided_slice %17 {offsets = [1, 0, 0], sizes = [1, 16, 16], strides = [1, 1, 1]} : vector<2x16x16xf32> to vector<1x16x16xf32>
    %23 = vector.shape_cast %22 : vector<1x16x16xf32> to vector<16x16xf32>
    %24 = arith.addf %21, %23 : vector<16x16xf32>
    %25 = arith.mulf %24, %14 : vector<16x16xf32>
    %cst_11 = arith.constant 0.000000e+00 : f32
    %26 = vector.broadcast %cst_11 : f32 to vector<16x16xf32>
    %27 = arith.select %19, %25, %26 : vector<16x16xi1>, vector<16x16xf32>
    %cst_12 = arith.constant dense<0.000000e+00> : vector<16xf32>
    %28 = vector.multi_reduction <add>, %27, %cst_12 [0] : vector<16x16xf32> to vector<16xf32>
    %29 = vector.shape_cast %28 : vector<16xf32> to vector<1x16xf32>
    %c0_13 = arith.constant 0 : index
    %c0_14 = arith.constant 0 : index
    %c0_15 = arith.constant 0 : index
    %30 = vector.load %arg3[%c0_13, %c0_14, %c0_15] : memref<1x2x16xf32, #tpu.memory_space<vmem>>, vector<1x1x16xf32>
    %31 = vector.shape_cast %30 : vector<1x1x16xf32> to vector<1x16xf32>
    %32 = vector.shape_cast %29 : vector<1x16xf32> to vector<1x1x16xf32>
    tpu.vector_store %arg3[%c0_13, %c0_14, %c0_15], %32 {strides = array<i32>} : memref<1x2x16xf32, #tpu.memory_space<vmem>>, vector<1x1x16xf32>,
    %c15_i32_16 = arith.constant 15 : i32
    %33 = tpu.dynamic_rotate %3 by %c15_i32_16 dim 2 : vector<3x16x16xf32>, i32 -> vector<3x16x16xf32>
    %34 = arith.subf %3, %33 : vector<3x16x16xf32>
    %35 = math.absf %34 : vector<3x16x16xf32>
    %cst_17 = arith.constant dense<0.000000e+00> : vector<16x16xf32>
    %36 = vector.multi_reduction <add>, %35, %cst_17 [0] : vector<3x16x16xf32> to vector<16x16xf32>
    %cst_18 = arith.constant 3.000000e+00 : f32
    %37 = vector.broadcast %cst_18 : f32 to vector<16x16xf32>
    %38 = arith.divf %36, %37 : vector<16x16xf32>
    %cst_19 = arith.constant 0.000000e+00 : f32
    %39 = vector.broadcast %cst_19 : f32 to vector<16x16xf32>
    %40 = arith.subf %39, %38 : vector<16x16xf32>
    %41 = math.exp %40 : vector<16x16xf32>
    %c15_i32_20 = arith.constant 15 : i32
    %42 = tpu.dynamic_rotate %1 by %c15_i32_20 dim 2 : vector<2x16x16xf32>, i32 -> vector<2x16x16xf32>
    %43 = arith.subf %1, %42 : vector<2x16x16xf32>
    %44 = math.absf %43 : vector<2x16x16xf32>
    %c15_i32_21 = arith.constant 15 : i32
    %45 = vector.broadcast %c15_i32_21 : i32 to vector<16x16xi32>
    %46 = arith.cmpi slt, %5, %45 : vector<16x16xi32>
    %47 = vector.extract_strided_slice %44 {offsets = [0, 0, 0], sizes = [1, 16, 16], strides = [1, 1, 1]} : vector<2x16x16xf32> to vector<1x16x16xf32>
    %48 = vector.shape_cast %47 : vector<1x16x16xf32> to vector<16x16xf32>
    %49 = vector.extract_strided_slice %44 {offsets = [1, 0, 0], sizes = [1, 16, 16], strides = [1, 1, 1]} : vector<2x16x16xf32> to vector<1x16x16xf32>
    %50 = vector.shape_cast %49 : vector<1x16x16xf32> to vector<16x16xf32>
    %51 = arith.addf %48, %50 : vector<16x16xf32>
    %52 = arith.mulf %51, %41 : vector<16x16xf32>
    %cst_22 = arith.constant 0.000000e+00 : f32
    %53 = vector.broadcast %cst_22 : f32 to vector<16x16xf32>
    %54 = arith.select %46, %52, %53 : vector<16x16xi1>, vector<16x16xf32>
    %cst_23 = arith.constant dense<0.000000e+00> : vector<16xf32>
    %55 = vector.multi_reduction <add>, %54, %cst_23 [0] : vector<16x16xf32> to vector<16xf32>
    %56 = vector.shape_cast %55 : vector<16xf32> to vector<1x16xf32>
    %c0_24 = arith.constant 0 : index
    %c1 = arith.constant 1 : index
    %c0_25 = arith.constant 0 : index
    %57 = vector.load %arg3[%c0_24, %c1, %c0_25] : memref<1x2x16xf32, #tpu.memory_space<vmem>>, vector<1x1x16xf32>
    %58 = vector.shape_cast %57 : vector<1x1x16xf32> to vector<1x16xf32>
    %59 = vector.shape_cast %56 : vector<1x16xf32> to vector<1x1x16xf32>
    tpu.vector_store %arg3[%c0_24, %c1, %c0_25], %59 {strides = array<i32>} : memref<1x2x16xf32, #tpu.memory_space<vmem>>, vector<1x1x16xf32>,
    return
  }
  func.func @transform_0(%arg0: i32) -> (i32, i32, i32, i32) {
    %c0_i32 = arith.constant 0 : i32
    %c0_i32_0 = arith.constant 0 : i32
    %c0_i32_1 = arith.constant 0 : i32
    %c0_i32_2 = arith.constant 0 : i32
    return %arg0, %c0_i32, %c0_i32_0, %c0_i32_1 : i32, i32, i32, i32
  }
  func.func @transform_1(%arg0: i32) -> (i32, i32, i32, i32) {
    %c0_i32 = arith.constant 0 : i32
    %c0_i32_0 = arith.constant 0 : i32
    %c0_i32_1 = arith.constant 0 : i32
    %c0_i32_2 = arith.constant 0 : i32
    return %arg0, %c0_i32, %c0_i32_0, %c0_i32_1 : i32, i32, i32, i32
  }
  func.func @transform_2(%arg0: i32) -> (i32, i32, i32) {
    %c0_i32 = arith.constant 0 : i32
    %c0_i32_0 = arith.constant 0 : i32
    %c0_i32_1 = arith.constant 0 : i32
    return %arg0, %c0_i32, %c0_i32_0 : i32, i32, i32
  }
}

</mosaic_0001>

<bundles_post_ra>
// kernel: tpu_custom_call.1
= control target key start
LH: loop header
LB: loop body
LE: loop exit
PB: predicated region body
PF: predicated region fallthrough
CT: control target
= control target key end

     0   :  { %7 = vsyncpa [#allocation3], 0  ;;  %s1191_s0 = inlined_call_operand.hbm [shape: f32[2,2,16,16], index: 0, kind: input, shape index: {}]   ;;  %s1192_s1 = inlined_call_operand.hbm [shape: f32[2,3,16,16], index: 1, kind: input, shape index: {}]   ;;  %s1193_s2 = inlined_call_operand.hbm [shape: f32[2,2,16], index: 2, kind: output, shape index: {}]  }
   0x1   :  { %9 = vsyncpa [#allocation3 + $0x1], 0 }
   0x2   :  { %10 = vsyncpa [#allocation6], 0 }
   0x3   :  { %12 = vsyncpa [#allocation6 + $0x1], 0 }
   0x4   :  { %13 = vsyncpa [#allocation4], 0 }
   0x5   :  { %15 = vsyncpa [#allocation4 + $0x1], 0  ;;  %s795_s9 = smov 0   ;;  %s797_s10 = smov 0  }
   0x6   :  { %s799_s11 = smov 0   ;;  %s801_s12 = smov 0  }
   0x7 LB: > { %s816_s13 = sadd.s32 4294967295, %s771_s12   ;;  %s560_s14 = sadd.s32 4294967294, %s771_s12   ;;  %s771_s12 = sphi %s801_s12, %s1209_s12   ;;  %s767_s11 = sphi %s799_s11, %s1208_s11   ;;  %s763_s10 = sphi %s797_s10, %s1207_s10   ;;  %s759_s9 = sphi %s795_s9, %s1206_s9  }
   0x8   : > { %s820_s15 = sadd.s32 1, %s771_s12   ;;  %s28_s16 = sadd.s32 1, %s767_s11 }
   0x9   : > { %s25_s17 = ssub.s32 %s771_s12, %s820_s15  ;;  %p35_p0 = scmp.ne.s32.totalorder %s767_s11, %s763_s10 }
   0xa   : > { %p26_p1 = scmp.eq.s32.totalorder %s25_s17, 0  ;;  %p36_p2 = scmp.eq.s32.totalorder %s771_s12, 0 }
   0xb   : > { %p41_p3 = scmp.ne.s32.totalorder %s763_s10, %s759_s9  ;;  %p42_p4 = scmp.eq.s32.totalorder %s816_s13, 0 }
   0xc   : > { %s832_s18 = scalar_select %p26_p1, %s767_s11, %s28_s16  }
   0xd   : > { %p834_p5 = por %p36_p2, %p35_p0  ;;  %p838_p6 = por %p42_p4, %p41_p3 }
   0xe   : > { %p91_p7 = scmp.eq.s32.totalorder %s816_s13, 1  ;;  %p97_p8 = scmp.eq.s32.totalorder %s560_s14, 1 }
   0xf   : > { %s1197_s20 = scalar_select %p838_p6, 1, 0 }
  0x10   : > { %p595_p10 = scmp.lt.s32.totalorder %s771_s12, 2  ;;  %p845_p11 = por %p91_p7, %p35_p0 }
  0x11   : > { %p849_p12 = por %p97_p8, %p41_p3  ;;  %s854_s23 = sand.u32 1, %s767_s11  }
  0x12   : > { %s1198_s21 = scalar_select %p845_p11, 1, 0 }
  0x13   : > { %s1199_s22 = scalar_select %p849_p12, 1, 0 }
  0x14   : > { %s574_s24 = sshll.u32 %s771_s12, 9  ;;  %s563_s25 = sshll.u32 %s854_s23, 5 }
  0x15   : > { %s861_s28 = scalar_lea.hbm %s1191_s0, %s574_s24  ;;  %s121_s29 = scalar_lea.vmem [#allocation2], %s563_s25 }
  0x16   : > { %s128_s30 = sshll.u32 %s121_s29, 4  ;;  %p865_p13 = pnand %p595_p10, %p834_p5  ;;  %s869_s30 = int_to_ptr.vmem [resolvable:$true] %s128_s30 }
  0x17   : > { %s118_s4 = scalar_lea.sflag [#allocation3], %s854_s23  ;;  %s641_s5 = scalar_lea.hbm %s861_s28, 512 }
  0x18   : > { %p642_p0 = scmp.ne.s32.totalorder %s861_s28, %s641_s5  ;;  %p643_p1 = pneg %p865_p13 }
  0x19   : > { %s646_s8 = scalar_lea.hbm %s1191_s0, 1024  ;;  %p647_p4 = scmp.lt.u32.totalorder %s861_s28, %s1191_s0 }
  0x1a   : > { %p644_p2 = pnand %p643_p1, %p642_p0  ;;  %p648_p5 = scmp.lt.u32.totalorder %s646_s8, %s641_s5 }
  0x1b   : > { %p650_p8 = scmp.lt.u32.totalorder %s641_s5, %s861_s28 }
  0x1c   : > { %p645_p3 = pneg %p644_p2  ;;  %p649_p7 = por %p648_p5, %p647_p4 }
  0x1e   : > { %p651_p10 = por %p650_p8, %p649_p7 }
  0x20   : > { %p652_p9 = pnand %p651_p10, %p645_p3 }
  0x22   : > { %655 = shalt.err (!%p652_p9)
}
  0x23   : > { %s656_s17 = scalar_lea.vmem %s869_s30, 512  ;;  %s773_s19 = smov [#allocation2]  }
  0x24   : > { %p657_p0 = scmp.ne.s32.totalorder %s869_s30, %s656_s17  ;;  %s661_s24 = sshll.u32 %s773_s19, 4  ;;  %s662_s24 = int_to_ptr.vmem [resolvable:$false] %s661_s24 }
  0x25   : > { %s663_s25 = scalar_lea.vmem %s662_s24, 1024  ;;  %p664_p11 = scmp.lt.s32.totalorder %s869_s30, %s662_s24 }
  0x26   : > { %p659_p2 = pnand %p657_p0, %p643_p1  ;;  %p665_p4 = scmp.lt.s32.totalorder %s663_s25, %s656_s17 }
  0x28   : > { %p660_p12 = pneg %p659_p2  ;;  %p666_p5 = por %p665_p4, %p664_p11 }
  0x2a   : > { %p667_p7 = pnand %p666_p5, %p660_p12 }
  0x2c   : > { %670 = shalt.err (!%p667_p7)
}
  0x2d   : > { %s774_s26 = smov 128   ;;  %s775_s27 = smov 8  }
  0x2e   : > { %587 = dma.hbm_to_vmem [thread:$0]  (!%p865_p13), %s861_s28, 512, %s869_s30, %s118_s4, %s774_s26, %s774_s26, %s775_s27  }
  0x2f   : > { %p567_p9 = scmp.ge.s32.totalorder %s771_s12, 1  ;;  %p157_p11 = scmp.lt.s32.totalorder %s771_s12, 3 }
  0x30   : > { %s575_s29 = smul.u32 48, %s854_s23  ;;  %s139_s28 = scalar_lea.sflag [#allocation6], %s854_s23 }
  0x31   : > { %p905_p12 = pnand %p567_p9, %p157_p11  ;;  %s576_s6 = smul.u32 768, %s771_s12 }
  0x32   : > { %s142_s16 = scalar_lea.vmem [#allocation5], %s575_s29  ;;  %s676_s24 = scalar_lea.hbm %s1192_s1, 1536 }
  0x33   : > { %s913_s14 = scalar_lea.hbm %s1192_s1, %s576_s6  ;;  %s149_s17 = sshll.u32 %s142_s16, 4  ;;  %s915_s17 = int_to_ptr.vmem [resolvable:$true] %s149_s17 }
  0x34   : > { %s671_s30 = scalar_lea.hbm %s913_s14, 768  ;;  %p677_p0 = scmp.lt.u32.totalorder %s913_s14, %s1192_s1 }
  0x35   : > { %p672_p3 = scmp.ne.s32.totalorder %s913_s14, %s671_s30  ;;  %p678_p2 = scmp.lt.u32.totalorder %s676_s24, %s671_s30 }
  0x36   : > { %p680_p5 = scmp.lt.u32.totalorder %s671_s30, %s913_s14 }
  0x37   : > { %p674_p8 = pnand %p672_p3, %p643_p1  ;;  %p679_p4 = por %p678_p2, %p677_p0 }
  0x39   : > { %p675_p10 = pneg %p674_p8  ;;  %p681_p7 = por %p680_p5, %p679_p4 }
  0x3b   : > { %p682_p9 = pnand %p681_p7, %p675_p10 }
  0x3d   : > { %685 = shalt.err (!%p682_p9)
}
  0x3e   : > { %s686_s29 = scalar_lea.vmem %s915_s17, 768  ;;  %s776_s7 = smov [#allocation5]  }
  0x3f   : > { %p687_p11 = scmp.ne.s32.totalorder %s915_s17, %s686_s29  ;;  %s691_s8 = sshll.u32 %s776_s7, 4  ;;  %s692_s8 = int_to_ptr.vmem [resolvable:$false] %s691_s8 }
  0x40   : > { %s693_s16 = scalar_lea.vmem %s692_s8, 1536  ;;  %p694_p6 = scmp.lt.s32.totalorder %s915_s17, %s692_s8 }
  0x41   : > { %p689_p3 = pnand %p687_p11, %p643_p1  ;;  %p695_p0 = scmp.lt.s32.totalorder %s693_s16, %s686_s29 }
  0x43   : > { %p690_p8 = pneg %p689_p3  ;;  %p696_p2 = por %p695_p0, %p694_p6 }
  0x45   : > { %p697_p4 = pnand %p696_p2, %p690_p8 }
  0x47   : > { %700 = shalt.err (!%p697_p4)
}
  0x48   : > { %590 = dma.hbm_to_vmem [thread:$0]  (!%p865_p13), %s913_s14, 768, %s915_s17, %s139_s28, %s774_s26, %s774_s26, %s775_s27  }
  0x49   : > { %161 = sbr.rel (%p905_p12) target bundleno = 501 (0x1f5), region = 28  ;;  %s949_s30 = sand.u32 (!%p905_p12), 1, %s763_s10  }
  0x4a   : > { %s568_s4 = sshll.u32 (!%p905_p12), %s949_s30, 5  ;;  %s164_s19 = scalar_lea.sflag (!%p905_p12), [#allocation3], %s949_s30 }
  0x4b   : > { %s167_s3 = scalar_lea.vmem (!%p905_p12), [#allocation2], %s568_s4  ;;  %p1202_p6 = scmp.ne.s32.totalorder (!%p905_p12), %s1197_s20, 0 }
  0x50   : > { %746 = dma.done.wait (%p1202_p6), %s164_s19, 512  }
  0x51   : > { %748 = vsyncadd (%p1202_p6), %s164_s19, 4294966784  ;;  %s577_s23 = smul.u32 48, %s949_s30  ;;  %s173_s26 = scalar_lea.sflag [#allocation6], %s949_s30 }
  0x53   : > { %s176_s27 = scalar_lea.vmem [#allocation5], %s577_s23 }
  0x54   : > { %750 = dma.done.wait (%p1202_p6), %s173_s26, 768  }
  0x55   : > { %752 = vsyncadd (%p1202_p6), %s173_s26, 4294966528  ;;  %v963_v0 = vld [vmem:[%s176_s27] sm:$0xff]  ;;  %v965_v1 = vld [vmem:[%s176_s27 + $0x10] sm:$0xff]  ;;  %s777_s5 = smov 16   ;;  %vm297_vm0 = vcmask 1047680   ;;  %v212_v30 = vlaneseq  ;;  %vm242_vm2 = vcmask 130048  }
  0x56   : > { %298 = vrot.lane.b32.xlu0 %v963_v0, %s777_s5  ;;  %304 = vrot.lane.b32.xlu1 %v965_v1, %s777_s5  ;;  %v971_v2 = vld [vmem:[%s176_s27 + $0x8] sm:$0xff]  ;;  %v973_v3 = vld [vmem:[%s176_s27 + $0x18] sm:$0xff]  ;;  %v217_v31 = vrot.slane %v963_v0, 1  ;;  %v218_v32 = vrot.slane %v965_v1, 1  ;;  %s778_s20 = smov 127   ;;  %s569_s14 = sshll.u32 %s949_s30, 1 }
  0x57   : > { %v979_v4 = vld [vmem:[%s176_s27 + $0x20] sm:$0xff]  ;;  %v981_v5 = vld [vmem:[%s176_s27 + $0x28] sm:$0xff]  ;;  %v220_v33 = vrot.slane %v971_v2, 1  ;;  %v221_v34 = vrot.slane %v973_v3, 1  ;;  %v1038_v35 = vshrl.u32 %v212_v30, 7  ;;  %vm295_vm4 = vcmask 122880  }
  0x58   : > { %v987_v6 = vld [vmem:[%s167_s3 + $0x8] sm:$0xff]  ;;  %v989_v7 = vld [vmem:[%s167_s3] sm:$0xff]  ;;  %v995_v8 = vld [vmem:[%s167_s3 + $0x18] sm:$0xff]  ;;  %v219_v36 = vrot.slane %v979_v4, 1  ;;  %v222_v37 = vrot.slane %v981_v5, 1  ;;  %s1117_s17 = scalar_lea.vmem [#allocation7], %s569_s14 }
  0x59   : > { %v997_v9 = vld [vmem:[%s167_s3 + $0x10] sm:$0xff]  ;;  %vm223_vm1 = vcmp.lt.s32.totalorder %v1038_v35, 7  ;;  %s571_s28 = sshll.u32 %s816_s13, 5  ;;  %s467_s24 = sshll.u32 %s1117_s17, 4  ;;  %s1147_s24 = int_to_ptr.vmem [resolvable:$true] %s467_s24 }
  0x5a   : > { %301 = vrot.lane.b32.xlu0 %v971_v2, %s777_s5  ;;  %307 = vrot.lane.b32.xlu1 %v973_v3, %s777_s5  ;;  %v227_v38 = vsel %vm223_vm1, %v220_v33, %v217_v31  ;;  %v228_v39 = vsel %vm223_vm1, %v221_v34, %v218_v32  ;;  %v224_v40 = vsel %vm223_vm1, %v217_v31, %v220_v33  ;;  %s1145_s29 = scalar_lea.hbm %s1193_s2, %s571_s28  ;;  %s454_s7 = scalar_lea.sflag [#allocation4], %s949_s30 }
  0x5b   : > { %v225_v41 = vsel %vm223_vm1, %v218_v32, %v221_v34  ;;  %v231_v42 = vsub.f32 %v971_v2, %v227_v38  ;;  %v233_v43 = vsub.f32 %v973_v3, %v228_v39  ;;  %v229_v45 = vsel %vm223_vm1, %v222_v37, %v219_v36  ;;  %s701_s8 = scalar_lea.vmem %s1147_s24, 32  ;;  %p1203_p1 = scmp.ne.s32.totalorder %s1198_s21, 0 }
  0x5c   : > { %v230_v46 = vsub.f32 %v963_v0, %v224_v40  ;;  %v232_v47 = vsub.f32 %v965_v1, %v225_v41  ;;  %v226_v49 = vsel %vm223_vm1, %v219_v36, %v222_v37  ;;  %v235_v50 = vsub.f32 %v981_v5, %v229_v45  ;;  %p702_p13 = scmp.ne.s32.totalorder %s1147_s24, %s701_s8  ;;  %s779_s13 = smov [#allocation7]  }
  0x5d   : > { %v237_v51 = vand.u32 2147483647, %v231_v42  ;;  %v234_v52 = vsub.f32 %v979_v4, %v226_v49  ;;  %v239_v55 = vand.u32 2147483647, %v233_v43  ;;  %s705_s16 = sshll.u32 %s779_s13, 4  ;;  %s706_s16 = int_to_ptr.vmem [resolvable:$false] %s705_s16 }
  0x5e   : > { %310 = vrot.lane.b32.xlu0 %v979_v4, %s777_s5  ;;  %313 = vrot.lane.b32.xlu1 %v981_v5, %s777_s5  ;;  %v236_v53 = vand.u32 2147483647, %v230_v46  ;;  %v238_v54 = vand.u32 2147483647, %v232_v47  ;;  %v241_v56 = vand.u32 2147483647, %v235_v50  ;;  %p703_p12 = pnand %p702_p13, %p1203_p1  ;;  %p708_p5 = scmp.lt.s32.totalorder %s1147_s24, %s706_s16 }
  0x5f   : > { %v248_v57 = vsel %vm242_vm2, %v237_v51, 0.0  ;;  %v240_v60 = vand.u32 2147483647, %v234_v52  ;;  %v249_v61 = vsel %vm242_vm2, %v239_v55, 0.0  ;;  %s707_s4 = scalar_lea.vmem %s706_s16, 64 }
  0x60   : > { %v243_v62 = vsel %vm242_vm2, %v236_v53, 0.0  ;;  %v244_v63 = vsel %vm242_vm2, %v238_v54, 0.0  ;;  %v214_v54 = vadd.s32 8, %v1038_v35  ;;  %p704_p10 = pneg %p703_p12  ;;  %p709_p7 = scmp.lt.s32.totalorder %s707_s4, %s701_s8 }
  0x62   : > { %391 = vrot.lane.b32.xlu1 %v987_v6, %s777_s5  ;;  %388 = vrot.lane.b32.xlu0 %v989_v7, %s777_s5  ;;  %vm279_vm3 = vcmp.lt.s32.totalorder %v214_v54, 15  ;;  %p710_p9 = por %p709_p7, %p708_p5 }
  0x64   : > { %p711_p11 = pnand %p710_p9, %p704_p10 }
  0x66   : > { %397 = vrot.lane.b32.xlu1 %v995_v8, %s777_s5  ;;  %394 = vrot.lane.b32.xlu0 %v997_v9, %s777_s5 }
  0xc8   : > { %v299_v10 = vpop.permute.xlu0 %298  ;;  %v305_v11 = vpop.permute.xlu1 %304 }
  0xc9   : > { %v300_v12 = vsel %vm297_vm0, %v299_v10, %v963_v0  ;;  %v306_v13 = vsel %vm297_vm0, %v305_v11, %v965_v1 }
  0xca   : > { %316 = vrot.lane.b32.xlu0 %v300_v12, %s777_s5  ;;  %v250_v12 = vadd.f32 %v249_v61, %v248_v57 }
  0xcc   : > { %v302_v14 = vpop.permute.xlu0 %301  ;;  %v308_v15 = vpop.permute.xlu1 %307 }
  0xcd   : > { %v303_v16 = vsel %vm297_vm0, %v302_v14, %v971_v2  ;;  %v309_v17 = vsel %vm297_vm0, %v308_v15, %v973_v3  ;;  %v245_v14 = vadd.f32 %v244_v63, %v243_v62  ;;  %v246_v15 = vsel %vm242_vm2, %v240_v60, 0.0 }
  0xce   : > { %318 = vrot.lane.b32.xlu1 %v303_v16, %s777_s5  ;;  %320 = vrot.lane.b32.xlu0 %v306_v13, %s777_s5  ;;  %v251_v13 = vsel %vm242_vm2, %v241_v56, 0.0 }
  0xcf   : > { %v252_v16 = vadd.f32 %v251_v13, %v250_v12 }
  0xd0   : > { %v311_v18 = vpop.permute.xlu0 %310  ;;  %v314_v19 = vpop.permute.xlu1 %313 }
  0xd1   : > { %v312_v20 = vsel %vm297_vm0, %v311_v18, %v979_v4  ;;  %v315_v21 = vsel %vm297_vm0, %v314_v19, %v981_v5  ;;  %v247_v19 = vadd.f32 %v246_v15, %v245_v14 }
  0xd2   : > { %322 = vrot.lane.b32.xlu1 %v309_v17, %s777_s5  ;;  %324 = vrot.lane.b32.xlu0 %v312_v20, %s777_s5  ;;  %v264_v20 = vrot.slane %v987_v6, 1 }
  0xd4   : > { %v392_v22 = vpop.permute.xlu1 %391  ;;  %v389_v23 = vpop.permute.xlu0 %388 }
  0xd5   : > { %v390_v24 = vsel %vm297_vm0, %v389_v23, %v989_v7  ;;  %v393_v25 = vsel %vm297_vm0, %v392_v22, %v987_v6  ;;  %v255_v23 = vmul.f32 0.33333334, %v252_v16 }
  0xd6   : > { %326 = vrot.lane.b32.xlu1 %v315_v21, %s777_s5  ;;  %400 = vrot.lane.b32.xlu0 %v390_v24, %s777_s5  ;;  %v262_v24 = vrot.slane %v989_v7, 1 }
  0xd8   : > { %v398_v26 = vpop.permute.xlu1 %397  ;;  %v395_v27 = vpop.permute.xlu0 %394  ;;  %v268_v38 = vsel %vm223_vm1, %v264_v20, %v262_v24 }
  0xd9   : > { %v396_v28 = vsel %vm297_vm0, %v395_v27, %v997_v9  ;;  %v399_v29 = vsel %vm297_vm0, %v398_v26, %v995_v8  ;;  %v263_v26 = vrot.slane %v997_v9, 1  ;;  %v254_v27 = vmul.f32 0.33333334, %v247_v19 }
  0xda   : > { %402 = vrot.lane.b32.xlu1 %v393_v25, %s777_s5  ;;  %404 = vrot.lane.b32.xlu0 %v396_v28, %s777_s5  ;;  %v265_v25 = vrot.slane %v995_v8, 1  ;;  %v257_v28 = vsub.f32 0.0, %v255_v23  ;;  %v271_v40 = vsub.f32 %v987_v6, %v268_v38 }
  0xdb   : > { %v256_v32 = vsub.f32 0.0, %v254_v27 }
  0xdc   : > { %v260_v36 = vmul.f32 1.442695, %v257_v28  ;;  %v269_v37 = vsel %vm223_vm1, %v265_v25, %v263_v26  ;;  %v275_v47 = vand.u32 2147483647, %v271_v40  ;;  %v267_v49 = vsel %vm223_vm1, %v263_v26, %v265_v25 }
  0xdd   : > { %v273_v39 = vsub.f32 %v995_v8, %v269_v37  ;;  %v258_v41 = vmul.f32 1.442695, %v256_v32  ;;  %v272_v52 = vsub.f32 %v997_v9, %v267_v49 }
  0xde   : > { %406 = vrot.lane.b32.xlu1 %v399_v29, %s777_s5  ;;  %633 = vpow2.f32 %v260_v36 }
  0xdf   : > { %v277_v46 = vand.u32 2147483647, %v273_v39  ;;  %635 = vpow2.f32 %v258_v41  ;;  %v276_v57 = vand.u32 2147483647, %v272_v52 }
  0xe1   : > { %v281_v55 = vadd.f32 %v277_v46, %v275_v47 }
 0x13c   : > { %v317_v44 = vpop.permute.xlu0 %316 }
 0x13d   : > { %v328_v48 = vsel %vm297_vm0, %v317_v44, %v963_v0 }
 0x13e   : > { %340 = vrot.lane.b32.xlu0 %v328_v48, %s778_s20  ;;  %v266_v48 = vsel %vm223_vm1, %v262_v24, %v264_v20 }
 0x13f   : > { %v270_v51 = vsub.f32 %v989_v7, %v266_v48 }
 0x140   : > { %v319_v58 = vpop.permute.xlu1 %318  ;;  %v321_v59 = vpop.permute.xlu0 %320 }
 0x141   : > { %v329_v10 = vsel %vm297_vm0, %v319_v58, %v971_v2  ;;  %v330_v11 = vsel %vm297_vm0, %v321_v59, %v965_v1  ;;  %v274_v56 = vand.u32 2147483647, %v270_v51  ;;  %v634_v58 = vpop.eup %633 }
 0x142   : > { %342 = vrot.lane.b32.xlu1 %v329_v10, %s778_s20  ;;  %344 = vrot.lane.b32.xlu0 %v330_v11, %s778_s20  ;;  %v283_v60 = vmul.f32 %v634_v58, %v281_v55  ;;  %v636_v61 = vpop.eup %635 }
 0x143   : > { %v280_v59 = vadd.f32 %v276_v57, %v274_v56 }
 0x144   : > { %v323_v17 = vpop.permute.xlu1 %322  ;;  %v325_v18 = vpop.permute.xlu0 %324  ;;  %v285_v62 = vsel %vm279_vm3, %v283_v60, 0.0 }
 0x145   : > { %v331_v21 = vsel %vm297_vm0, %v323_v17, %v973_v3  ;;  %v332_v22 = vsel %vm297_vm0, %v325_v18, %v979_v4  ;;  %v287_v63 = vsel %vm242_vm2, %v285_v62, 0.0  ;;  %v282_v10 = vmul.f32 %v636_v61, %v280_v59 }
 0x146   : > { %346 = vrot.lane.b32.xlu1 %v331_v21, %s778_s20  ;;  %348 = vrot.lane.b32.xlu0 %v332_v22, %s778_s20  ;;  %v216_v59 = vand.u32 127, %v212_v30 }
 0x147   : > { %v286_v11 = vsel %vm242_vm2, %v282_v10, 0.0 }
 0x148   : > { %v327_v29 = vpop.permute.xlu1 %326  ;;  %v401_v31 = vpop.permute.xlu0 %400  ;;  %v288_v12 = vadd.f32 %v287_v63, %v286_v11  ;;  %vm436_vm5 = vcmp.lt.s32.totalorder %v216_v59, 15 }
 0x149   : > { %v333_v33 = vsel %vm297_vm0, %v327_v29, %v981_v5  ;;  %v408_v34 = vsel %vm297_vm0, %v401_v31, %v989_v7 }
 0x14a   : > { %350 = vrot.lane.b32.xlu1 %v333_v33, %s778_s20  ;;  %416 = vrot.lane.b32.xlu0 %v408_v34, %s778_s20  ;;  %v289_v13 = vrot.slane %v288_v12, 4 }
 0x14c   : > { %v403_v42 = vpop.permute.xlu1 %402  ;;  %v405_v43 = vpop.permute.xlu0 %404  ;;  %v290_v35 = vadd.f32 %v289_v13, %v288_v12 }
 0x14d   : > { %v409_v44 = vsel %vm297_vm0, %v403_v42, %v987_v6  ;;  %v410_v45 = vsel %vm297_vm0, %v405_v43, %v997_v9 }
 0x14e   : > { %418 = vrot.lane.b32.xlu1 %v409_v44, %s778_s20  ;;  %420 = vrot.lane.b32.xlu0 %v410_v45, %s778_s20  ;;  %v291_v14 = vrot.slane %v290_v35, 2 }
 0x150   : > { %v407_v50 = vpop.permute.xlu1 %406  ;;  %v292_v15 = vadd.f32 %v291_v14, %v290_v35 }
 0x151   : > { %v411_v53 = vsel %vm297_vm0, %v407_v50, %v995_v8 }
 0x152   : > { %422 = vrot.lane.b32.xlu1 %v411_v53, %s778_s20  ;;  %v293_v16 = vrot.slane %v292_v15, 1 }
 0x154   : > { %v294_v17 = vadd.f32 %v293_v16, %v292_v15 }
 0x156   : > { %296 = vst.msk [vmem:[%s1117_s17] sm:$0x1] %vm295_vm4, %v294_v17 }
 0x1b0   : > { %v341_v18 = vpop.permute.xlu0 %340 }
 0x1b1   : > { %v358_v19 = vsub.f32 %v963_v0, %v341_v18 }
 0x1b3   : > { %v364_v23 = vand.u32 2147483647, %v358_v19 }
 0x1b4   : > { %v343_v20 = vpop.permute.xlu1 %342  ;;  %v345_v21 = vpop.permute.xlu0 %344 }
 0x1b5   : > { %v360_v22 = vsub.f32 %v965_v1, %v345_v21  ;;  %v359_v24 = vsub.f32 %v971_v2, %v343_v20  ;;  %v370_v32 = vsel %vm242_vm2, %v364_v23, 0.0 }
 0x1b7   : > { %v366_v25 = vand.u32 2147483647, %v360_v22  ;;  %v365_v33 = vand.u32 2147483647, %v359_v24 }
 0x1b8   : > { %v347_v26 = vpop.permute.xlu1 %346  ;;  %v349_v27 = vpop.permute.xlu0 %348 }
 0x1b9   : > { %v371_v28 = vsel %vm242_vm2, %v366_v25, 0.0  ;;  %v361_v29 = vsub.f32 %v973_v3, %v347_v26  ;;  %v362_v31 = vsub.f32 %v979_v4, %v349_v27  ;;  %v375_v41 = vsel %vm242_vm2, %v365_v33, 0.0 }
 0x1ba   : > { %v372_v36 = vadd.f32 %v371_v28, %v370_v32 }
 0x1bb   : > { %v367_v0 = vand.u32 2147483647, %v361_v29  ;;  %v368_v34 = vand.u32 2147483647, %v362_v31 }
 0x1bc   : > { %v351_v37 = vpop.permute.xlu1 %350  ;;  %v417_v1 = vpop.permute.xlu0 %416 }
 0x1bd   : > { %v376_v38 = vsel %vm242_vm2, %v367_v0, 0.0  ;;  %v373_v2 = vsel %vm242_vm2, %v368_v34, 0.0  ;;  %v363_v39 = vsub.f32 %v981_v5, %v351_v37  ;;  %v428_v50 = vsub.f32 %v989_v7, %v417_v1 }
 0x1be   : > { %v374_v40 = vadd.f32 %v373_v2, %v372_v36  ;;  %v377_v42 = vadd.f32 %v376_v38, %v375_v41 }
 0x1bf   : > { %v369_v3 = vand.u32 2147483647, %v363_v39  ;;  %v432_v54 = vand.u32 2147483647, %v428_v50 }
 0x1c0   : > { %v380_v4 = vmul.f32 0.33333334, %v374_v40  ;;  %v419_v46 = vpop.permute.xlu1 %418  ;;  %v421_v47 = vpop.permute.xlu0 %420 }
 0x1c1   : > { %v378_v43 = vsel %vm242_vm2, %v369_v3, 0.0  ;;  %v430_v51 = vsub.f32 %v997_v9, %v421_v47  ;;  %v429_v56 = vsub.f32 %v987_v6, %v419_v46 }
 0x1c2   : > { %v382_v44 = vsub.f32 0.0, %v380_v4  ;;  %v379_v45 = vadd.f32 %v378_v43, %v377_v42 }
 0x1c3   : > { %v434_v55 = vand.u32 2147483647, %v430_v51  ;;  %v433_v60 = vand.u32 2147483647, %v429_v56 }
 0x1c4   : > { %v384_v48 = vmul.f32 1.442695, %v382_v44  ;;  %v381_v49 = vmul.f32 0.33333334, %v379_v45  ;;  %v423_v53 = vpop.permute.xlu1 %422 }
 0x1c5   : > { %v431_v57 = vsub.f32 %v995_v8, %v423_v53  ;;  %v437_v58 = vadd.f32 %v434_v55, %v432_v54 }
 0x1c6   : > { %637 = vpow2.f32 %v384_v48  ;;  %v383_v5 = vsub.f32 0.0, %v381_v49 }
 0x1c7   : > { %v435_v61 = vand.u32 2147483647, %v431_v57 }
 0x1c8   : > { %v386_v52 = vmul.f32 1.442695, %v383_v5 }
 0x1c9   : > { %v438_v62 = vadd.f32 %v435_v61, %v433_v60 }
 0x1ca   : > { %639 = vpow2.f32 %v386_v52 }
 0x1d0   : > { %v638_v7 = vpop.eup %637 }
 0x1d1   : > { %v439_v9 = vmul.f32 %v638_v7, %v437_v58 }
 0x1d3   : > { %v441_v11 = vsel %vm436_vm5, %v439_v9, 0.0 }
 0x1d4   : > { %v640_v63 = vpop.eup %639  ;;  %v443_v8 = vsel %vm242_vm2, %v441_v11, 0.0 }
 0x1d5   : > { %v440_v10 = vmul.f32 %v640_v63, %v438_v62 }
 0x1d7   : > { %v442_v12 = vsel %vm436_vm5, %v440_v10, 0.0 }
 0x1d8   : > { %v444_v6 = vsel %vm242_vm2, %v442_v12, 0.0 }
 0x1d9   : > { %v445_v30 = vadd.f32 %v444_v6, %v443_v8 }
 0x1db   : > { %v446_v13 = vrot.slane %v445_v30, 4 }
 0x1dd   : > { %v447_v35 = vadd.f32 %v446_v13, %v445_v30 }
 0x1df   : > { %v448_v14 = vrot.slane %v447_v35, 2 }
 0x1e1   : > { %v449_v15 = vadd.f32 %v448_v14, %v447_v35 }
 0x1e3   : > { %v450_v16 = vrot.slane %v449_v15, 1 }
 0x1e5   : > { %v451_v17 = vadd.f32 %v450_v16, %v449_v15 }
 0x1e7   : > { %452 = vst.msk [vmem:[%s1117_s17 + $0x1] sm:$0x1] %vm295_vm4, %v451_v17 }
 0x1e8   : > { %714 = shalt.err (!%p711_p11)
}
 0x1e9   : > { %s715_s30 = scalar_lea.hbm %s1145_s29, 32  ;;  %s719_s23 = scalar_lea.hbm %s1193_s2, 64 }
 0x1ea   : > { %p716_p3 = scmp.ne.s32.totalorder %s1145_s29, %s715_s30  ;;  %p720_p2 = scmp.lt.u32.totalorder %s1145_s29, %s1193_s2 }
 0x1eb   : > { %p721_p4 = scmp.lt.u32.totalorder %s719_s23, %s715_s30  ;;  %p723_p13 = scmp.lt.u32.totalorder %s715_s30, %s1145_s29 }
 0x1ec   : > { %p717_p8 = pnand %p716_p3, %p1203_p1 }
 0x1ed   : > { %p722_p6 = por %p721_p4, %p720_p2 }
 0x1ee   : > { %p718_p0 = pneg %p717_p8 }
 0x1ef   : > { %p724_p12 = por %p723_p13, %p722_p6 }
 0x1f1   : > { %p725_p10 = pnand %p724_p12, %p718_p0 }
 0x1f3   : > { %728 = shalt.err (!%p725_p10)
}
 0x1f4   : > { %582 = dma.vmem_to_hbm [thread:$0]  (%p1203_p1), %s1147_s24, 32, %s1145_s29, %s454_s7  }
 0x1f5 PF: > { %s479_s5 = sand.u32 1, %s759_s9   ;;  %p1204_p5 = scmp.ne.s32.totalorder %s1199_s22, 0 }
 0x1f6   : > { %p1205_p7 = scmp.ge.s32.totalorder %s771_s12, 2  ;;  %s480_s20 = scalar_lea.sflag [#allocation4], %s479_s5 }
 0x1f8   : > { %p592_p9 = pnand %p1205_p7, %p1204_p5 }
 0x1fa   : > { %754 = dma.done.wait (!%p592_p9), %s480_s20, 32  }
 0x1fb   : > { %756 = vsyncadd (!%p592_p9), %s480_s20, 4294967264  ;;  %p18_p11 = scmp.ge.s32.totalorder %s820_s15, 4   ;;  %s1206_s9 = smov %s763_s10 }
 0x1fc   : > { %s1207_s10 = smov %s767_s11  ;;  %s1208_s11 = smov %s832_s18 }
 0x1fd   : > { %s1209_s12 = smov %s820_s15  ;;  %20 = sbr.rel (!%p18_p11) target bundleno = 7 (0x7), region = 86 }
 0x204   :  { %485 = vsyncpa [#allocation3], 1 }
 0x205   :  { %487 = vsyncpa [#allocation3 + $0x1], 1 }
 0x206   :  { %488 = vsyncpa [#allocation6], 1 }
 0x207   :  { %490 = vsyncpa [#allocation6 + $0x1], 1 }
 0x208   :  { %491 = vsyncpa [#allocation4], 1 }
 0x209   :  { %493 = vsyncpa [#allocation4 + $0x1], 1 }

</bundles_post_ra>
